<compile_context>
chip_gen: v6e
topology: v6e:2x2x1
jax: 0.10.0
libtpu: 0.0.40
codegen_flags: <defaults>
</compile_context>

<pallas_src>
import functools
import math

import jax
import jax.numpy as jnp
from jax import lax
from jax.experimental import pallas as pl
from jax.experimental.pallas import tpu as pltpu

# TODO(synk): dropout_p and scale_factor are undefined globals in the PyTorch
#             source; we use dropout_p = 0.0 (identity) and scale_factor = 1/sqrt(D).
DROPOUT_P = 0.0


def _attn_kernel(q_ref, k_ref, v_ref, o_ref, *, scale):
    # Squeeze the B=1 batch dim: plain 2D contractions (one MXU push each).
    q = q_ref[0]          # (S, D)
    k = k_ref[0]          # (S, D)
    v = v_ref[0]          # (S, D)

    # scores = q @ k^T, contracting over D directly (no explicit k.T / XLU transpose).
    s = lax.dot_general(
        q, k,
        dimension_numbers=(((1,), (1,)), ((), ())),
        preferred_element_type=jnp.float32,
        precision=lax.Precision.HIGHEST,
    ) * scale                                              # (S, S)

    # Numerically-stable softmax over the key axis (exact division; kernel is
    # nowhere near VALU saturation, so approx EUP reciprocal buys nothing).
    m = jnp.max(s, axis=-1, keepdims=True)
    e = jnp.exp(s - m)
    p = e / jnp.sum(e, axis=-1, keepdims=True)

    # dropout_p == 0.0 -> identity (no masking / rescaling).

    # output = softmax(qk) @ v
    out = lax.dot_general(
        p, v,
        dimension_numbers=(((1,), (0,)), ((), ())),
        preferred_element_type=jnp.float32,
        precision=lax.Precision.HIGHEST,
    )                                                      # (S, D)
    o_ref[0] = out.astype(o_ref.dtype)


def sdpa_pallas(q, k, v):
    B, S, D = q.shape
    scale = 1.0 / math.sqrt(D)
    kernel = functools.partial(_attn_kernel, scale=scale)

    vmem_spec = lambda: pl.BlockSpec(memory_space=pltpu.MemorySpace.VMEM)
    return pl.pallas_call(
        kernel,
        out_shape=jax.ShapeDtypeStruct((B, S, D), q.dtype),
        in_specs=[vmem_spec(), vmem_spec(), vmem_spec()],
        out_specs=vmem_spec(),
    )(q, k, v)


def sdpa_reference(q, k, v):
    scale = 1.0 / math.sqrt(q.shape[-1])
    s = jnp.einsum("bqd,bkd->bqk", q, k, precision=lax.Precision.HIGHEST) * scale
    p = jax.nn.softmax(s, axis=-1)
    return jnp.einsum("bqk,bkd->bqd", p, v, precision=lax.Precision.HIGHEST)


if __name__ == "__main__":
    key = jax.random.PRNGKey(0)
    kq, kk, kv = jax.random.split(key, 3)

    B, S, D = 1, 8, 64  # matches the module's q/k/v shapes (1, 8, 64)
    q = jax.random.normal(kq, (B, S, D), dtype=jnp.float32)
    k = jax.random.normal(kk, (B, S, D), dtype=jnp.float32)
    v = jax.random.normal(kv, (B, S, D), dtype=jnp.float32)

    out = jax.block_until_ready(sdpa_pallas(q, k, v))
    ref = sdpa_reference(q, k, v)

    assert out.shape == (B, S, D)
    assert jnp.allclose(out, ref, atol=1e-5, rtol=1e-5), float(jnp.max(jnp.abs(out - ref)))

    print("KERNEL_OK")
</pallas_src>

<mosaic_0001>
module attributes {stable_mosaic.version = 11 : i64} {
  func.func @_attn_kernel(%arg0: memref<1x8x64xf32, #tpu.memory_space<vmem>>, %arg1: memref<1x8x64xf32, #tpu.memory_space<vmem>>, %arg2: memref<1x8x64xf32, #tpu.memory_space<vmem>>, %arg3: memref<1x8x64xf32, #tpu.memory_space<vmem>>) attributes {dimension_semantics = [], scalar_prefetch = 0 : i64, scratch_operands = 0 : i64, tpu.core_type = #tpu.core_type<tc>} {
    %c0 = arith.constant 0 : index
    %c0_0 = arith.constant 0 : index
    %c0_1 = arith.constant 0 : index
    %0 = vector.load %arg0[%c0, %c0_0, %c0_1] : memref<1x8x64xf32, #tpu.memory_space<vmem>>, vector<1x8x64xf32>
    %1 = vector.shape_cast %0 : vector<1x8x64xf32> to vector<8x64xf32>
    %c0_2 = arith.constant 0 : index
    %c0_3 = arith.constant 0 : index
    %c0_4 = arith.constant 0 : index
    %2 = vector.load %arg1[%c0_2, %c0_3, %c0_4] : memref<1x8x64xf32, #tpu.memory_space<vmem>>, vector<1x8x64xf32>
    %3 = vector.shape_cast %2 : vector<1x8x64xf32> to vector<8x64xf32>
    %c0_5 = arith.constant 0 : index
    %c0_6 = arith.constant 0 : index
    %c0_7 = arith.constant 0 : index
    %4 = vector.load %arg2[%c0_5, %c0_6, %c0_7] : memref<1x8x64xf32, #tpu.memory_space<vmem>>, vector<1x8x64xf32>
    %5 = vector.shape_cast %4 : vector<1x8x64xf32> to vector<8x64xf32>
    %cst = arith.constant dense<0.000000e+00> : vector<8x8xf32>
    %6 = tpu.matmul %1, %3, %cst {dimension_numbers = #tpu.dot_dimension_numbers<[1], [1], [0], [0], [0, 0, 1, 0], [], []>, precision = #tpu.contract_precision<fp32>} : vector<8x64xf32>, vector<8x64xf32>, vector<8x8xf32> -> vector<8x8xf32>
    %cst_8 = arith.constant 1.250000e-01 : f32
    %7 = vector.broadcast %cst_8 : f32 to vector<8x8xf32>
    %8 = arith.mulf %6, %7 : vector<8x8xf32>
    %cst_9 = arith.constant dense<0xFF800000> : vector<8xf32>
    %9 = vector.multi_reduction <maximumf>, %8, %cst_9 [1] : vector<8x8xf32> to vector<8xf32>
    %10 = vector.shape_cast %9 : vector<8xf32> to vector<8x1xf32>
    %11 = vector.broadcast %10 : vector<8x1xf32> to vector<8x8xf32>
    %12 = arith.subf %8, %11 : vector<8x8xf32>
    %13 = math.exp %12 : vector<8x8xf32>
    %cst_10 = arith.constant dense<0.000000e+00> : vector<8xf32>
    %14 = vector.multi_reduction <add>, %13, %cst_10 [1] : vector<8x8xf32> to vector<8xf32>
    %15 = vector.shape_cast %14 : vector<8xf32> to vector<8x1xf32>
    %16 = vector.broadcast %15 : vector<8x1xf32> to vector<8x8xf32>
    %17 = arith.divf %13, %16 : vector<8x8xf32>
    %cst_11 = arith.constant dense<0.000000e+00> : vector<8x64xf32>
    %18 = tpu.matmul %17, %5, %cst_11 {dimension_numbers = #tpu.dot_dimension_numbers<[1], [0], [0], [1], [0, 0, 1, 1], [], []>, precision = #tpu.contract_precision<fp32>} : vector<8x8xf32>, vector<8x64xf32>, vector<8x64xf32> -> vector<8x64xf32>
    %c0_12 = arith.constant 0 : index
    %c0_13 = arith.constant 0 : index
    %c0_14 = arith.constant 0 : index
    %19 = vector.load %arg3[%c0_12, %c0_13, %c0_14] : memref<1x8x64xf32, #tpu.memory_space<vmem>>, vector<1x8x64xf32>
    %20 = vector.shape_cast %19 : vector<1x8x64xf32> to vector<8x64xf32>
    %21 = vector.shape_cast %18 : vector<8x64xf32> to vector<1x8x64xf32>
    tpu.vector_store %arg3[%c0_12, %c0_13, %c0_14], %21 {strides = array<i32>} : memref<1x8x64xf32, #tpu.memory_space<vmem>>, vector<1x8x64xf32>,
    return
  }
}

</mosaic_0001>

<bundles_post_ra>
// kernel: tpu_custom_call.1
= control target key start
LH: loop header
LB: loop body
LE: loop exit
PB: predicated region body
PF: predicated region fallthrough
CT: control target
= control target key end

     0   :  { %8 = vsyncpa [#allocation3], 0  ;;  %s1245_s0 = inlined_call_operand.hbm [shape: f32[1,8,64], index: 0, kind: input, shape index: {}]   ;;  %s1246_s1 = inlined_call_operand.hbm [shape: f32[1,8,64], index: 1, kind: input, shape index: {}]   ;;  %s1247_s2 = inlined_call_operand.hbm [shape: f32[1,8,64], index: 2, kind: input, shape index: {}]   ;;  %s1248_s3 = inlined_call_operand.hbm [shape: f32[1,8,64], index: 3, kind: output, shape index: {}]  }
   0x1   :  { %9 = vsyncpa [#allocation6], 0 }
   0x2   :  { %10 = vsyncpa [#allocation4], 0  ;;  %s1165_s12 = smov [#allocation5]   ;;  %s1166_s14 = smov [#allocation2]  }
   0x3   :  { %s27_s13 = sshll.u32 %s1165_s12, 4  ;;  %s17_s15 = sshll.u32 %s1166_s14, 4  ;;  %s28_s13 = int_to_ptr.vmem [resolvable:$true] %s27_s13  ;;  %s18_s15 = int_to_ptr.vmem [resolvable:$true] %s17_s15 }
   0x4   :  { %s1087_s16 = scalar_lea.vmem %s28_s13, 128  ;;  %p1092_p1 = scmp.lt.s32.totalorder %s28_s13, %s28_s13 }
   0x5   :  { %p1088_p0 = scmp.ne.s32.totalorder %s28_s13, %s1087_s16  ;;  %p1093_p2 = scmp.lt.s32.totalorder %s1087_s16, %s1087_s16 }
   0x7   :  { %p1094_p3 = por %p1093_p2, %p1092_p1 }
   0x9   :  { %p1095_p4 = pnand %p1094_p3, %p1088_p0 }
   0xb   :  { %1098 = shalt.err (!%p1095_p4)
}
   0xc   :  { %30 = dma.hbm_to_vmem [thread:$0]  %s1246_s1, 128, %s28_s13, [#allocation6]  }
   0xd   :  { %s1107_s19 = scalar_lea.vmem %s18_s15, 128  ;;  %p1112_p6 = scmp.lt.s32.totalorder %s18_s15, %s18_s15 }
   0xe   :  { %p1108_p5 = scmp.ne.s32.totalorder %s18_s15, %s1107_s19  ;;  %p1113_p7 = scmp.lt.s32.totalorder %s1107_s19, %s1107_s19 }
  0x10   :  { %p1114_p8 = por %p1113_p7, %p1112_p6 }
  0x12   :  { %p1115_p9 = pnand %p1114_p8, %p1108_p5 }
  0x14   :  { %1118 = shalt.err (!%p1115_p9)
}
  0x15   :  { %20 = dma.hbm_to_vmem [thread:$0]  %s1245_s0, 128, %s18_s15, [#allocation3]  }
  0x16   :  { %s1167_s22 = smov [#allocation7]  }
  0x17   :  { %s37_s23 = sshll.u32 %s1167_s22, 4  ;;  %s38_s23 = int_to_ptr.vmem [resolvable:$true] %s37_s23 }
  0x18   :  { %s1127_s24 = scalar_lea.vmem %s38_s23, 128  ;;  %p1132_p11 = scmp.lt.s32.totalorder %s38_s23, %s38_s23 }
  0x19   :  { %p1128_p10 = scmp.ne.s32.totalorder %s38_s23, %s1127_s24  ;;  %p1133_p12 = scmp.lt.s32.totalorder %s1127_s24, %s1127_s24 }
  0x1b   :  { %p1134_p13 = por %p1133_p12, %p1132_p11 }
  0x1d   :  { %p1135_p0 = pnand %p1134_p13, %p1128_p10 }
  0x1f   :  { %1138 = shalt.err (!%p1135_p0)
}
  0x20   :  { %40 = dma.hbm_to_vmem [thread:$0]  %s1247_s2, 128, %s38_s23, [#allocation6]  }
  0x21   :  { %1159 = dma.done.wait [#allocation3], 128  }
  0x22   :  { %1160 = vsyncadd [#allocation3], 4294967168 }
  0x23   :  { %1161 = dma.done.wait [#allocation6], 256  }
  0x24   :  { %1162 = vsyncadd [#allocation6], 4294967040  ;;  %v1168_v0 = vmov 0.0   ;;  %vm1169_vm0 = vmmov 0   ;;  %vm53_vm1 = vcmask 523264   ;;  %v51_v1 = vld [vmem:[#allocation5] sm:$0xff] }
  0x25   :  { %1009 = vmatprep.subr.mxu0 %v1168_v0  ;;  %1011 = vmatprep.mubr.msk.f32.mxu0 %vm1169_vm0, %v1168_v0  ;;  %v50_v2 = vld [vmem:[#allocation2] sm:$0xff]  ;;  %v58_v3 = vsel %vm53_vm1, %v51_v1, 0  ;;  %vm507_vm2 = vcmask 64512   ;;  %v52_v39 = vld [vmem:[#allocation7] sm:$0xff]  ;;  %s1170_s0 = smov [#allocation8]  }
  0x26   :  { %1014 = vmatprep.subr.mxu1 %v1168_v0  ;;  %1016 = vmatprep.mubr.msk.f32.mxu1 %vm1169_vm0, %v1168_v0  ;;  %v55_v4 = vsel %vm53_vm1, %v50_v2, 0  ;;  %v91_v5 = vand.u32 4294901760, %v58_v3  ;;  %v553_v40 = vand.u32 4294901760, %v52_v39  ;;  %s975_s2 = sshll.u32 %s1170_s0, 4  ;;  %s976_s2 = int_to_ptr.vmem [resolvable:$true] %s975_s2 }
  0x27   :  { %v126_v6 = vand.u32 4294901760, %v55_v4  ;;  %s1139_s26 = scalar_lea.vmem %s976_s2, 128  ;;  %p1144_p2 = scmp.lt.s32.totalorder %s976_s2, %s976_s2 }
  0x28   :  { %1010 = vmatpush3.xpose.msra.mxu0 %v91_v5  ;;  %v168_v8 = vsub.f32 %v58_v3, %v91_v5  ;;  %v630_v41 = vsub.f32 %v52_v39, %v553_v40  ;;  %p1140_p1 = scmp.ne.s32.totalorder %s976_s2, %s1139_s26  ;;  %p1145_p3 = scmp.lt.s32.totalorder %s1139_s26, %s1139_s26 }
  0x29   :  { %v127_v7 = vsub.f32 %v55_v4, %v126_v6  ;;  %1019 = vmatprep.subr.mxu0 %v1168_v0 }
  0x2a   :  { %v169_v10 = vand.u32 4294901760, %v168_v8  ;;  %v631_v42 = vand.u32 4294901760, %v630_v41  ;;  %p1146_p4 = por %p1145_p3, %p1144_p2 }
  0x2b   :  { %v128_v9 = vand.u32 4294901760, %v127_v7 }
  0x2c   :  { %v170_v12 = vsub.f32 %v168_v8, %v169_v10  ;;  %v632_v43 = vsub.f32 %v630_v41, %v631_v42  ;;  %p1147_p5 = pnand %p1146_p4, %p1140_p1 }
  0x2d   :  { %v129_v11 = vsub.f32 %v127_v7, %v128_v9 }
  0x2e   :  { %v171_v14 = vand.u32 4294901760, %v170_v12  ;;  %v633_v44 = vand.u32 4294901760, %v632_v43 }
  0x2f   :  { %v130_v13 = vand.u32 4294901760, %v129_v11 }
  0x30   :  { %1015 = vmatpush3.xpose.msra.mxu1 %v171_v14 }
  0x31   :  { %1012 = vmatmul.mubr.f32.vlgmr.msra.gmra.mxu0 %v130_v13  ;;  %1024 = vmatprep.subr.mxu1 %v1168_v0 }
  0x32   :  { %1020 = vmatpush3.xpose.msra.mxu0 %v168_v8  ;;  %1021 = vmatprep.mubr.msk.f32.mxu0 %vm1169_vm0, %v1168_v0 }
  0x33   :  { %1029 = vmatprep.subr.mxu0 %v1168_v0  ;;  %1017 = vmatmul.mubr.f32.vlgmr.msra.gmra.mxu1 %v126_v6 }
  0x34   :  { %1025 = vmatpush3.xpose.msra.mxu1 %v91_v5  ;;  %1026 = vmatprep.mubr.msk.f32.mxu1 %vm1169_vm0, %v1168_v0 }
  0x35   :  { %1022 = vmatmul.mubr.f32.vlgmr.msra.gmra.mxu0 %v127_v7  ;;  %1034 = vmatprep.subr.mxu1 %v1168_v0 }
  0x36   :  { %1030 = vmatpush3.xpose.msra.mxu0 %v169_v10  ;;  %1031 = vmatprep.mubr.msk.f32.mxu0 %vm1169_vm0, %v1168_v0 }
  0x37   :  { %1027 = vmatmul.mubr.f32.vlgmr.msra.gmra.mxu1 %v128_v9  ;;  %1039 = vmatprep.subr.mxu0 %v1168_v0 }
  0x38   :  { %1035 = vmatpush3.xpose.msra.mxu1 %v91_v5  ;;  %1036 = vmatprep.mubr.msk.f32.mxu1 %vm1169_vm0, %v1168_v0 }
  0x39   :  { %1032 = vmatmul.mubr.f32.vlgmr.msra.gmra.mxu0 %v126_v6  ;;  %1044 = vmatprep.subr.mxu1 %v1168_v0 }
  0x3a   :  { %1041 = vmatprep.mubr.msk.f32.mxu0 %vm1169_vm0, %v1168_v0  ;;  %1040 = vmatpush3.msra.mxu0 %v553_v40 }
  0x3b   :  { %1037 = vmatmul.mubr.f32.vlgmr.msra.gmra.mxu1 %v126_v6  ;;  %1049 = vmatprep.subr.mxu0 %v1168_v0 }
  0x3c   :  { %1046 = vmatprep.mubr.msk.f32.mxu1 %vm1169_vm0, %v1168_v0  ;;  %1045 = vmatpush3.msra.mxu1 %v633_v44 }
  0x3d   :  { %1054 = vmatprep.subr.mxu1 %v1168_v0 }
  0xf1   :  { %v132_v15 = vpop.f32.mrf.mxu0 }
  0xf3   :  { %v1013_v16 = vpop.f32.mrf.mxu0  ;;  %v208_v17 = vpop.f32.mrf.mxu1 }
  0xf4   :  { %v209_v18 = vadd.f32 %v208_v17, %v132_v15 }
  0xf5   :  { %v282_v19 = vpop.f32.mrf.mxu0  ;;  %v1018_v20 = vpop.f32.mrf.mxu1 }
  0xf6   :  { %v283_v21 = vadd.f32 %v282_v19, %v209_v18 }
  0xf7   :  { %v1023_v22 = vpop.f32.mrf.mxu0  ;;  %v356_v23 = vpop.f32.mrf.mxu1 }
  0xf8   :  { %v357_v24 = vadd.f32 %v356_v23, %v283_v21 }
  0xf9   :  { %v430_v25 = vpop.f32.mrf.mxu0  ;;  %v1028_v26 = vpop.f32.mrf.mxu1 }
  0xfa   :  { %v431_v27 = vadd.f32 %v430_v25, %v357_v24 }
  0xfb   :  { %v1033_v28 = vpop.f32.mrf.mxu0  ;;  %v502_v29 = vpop.f32.mrf.mxu1 }
  0xfc   :  { %v503_v30 = vadd.f32 %v502_v29, %v431_v27 }
  0xfd   :  { %v1038_v31 = vpop.f32.mrf.mxu1 }
  0xfe   :  { %v506_v32 = vmul.f32 0.125, %v503_v30 }
 0x100   :  { %v508_v33 = vsel %vm507_vm2, %v506_v32, -inf }
 0x101   :  { %509 = vmax.xlane.f32.xlu0 %v508_v33 }
 0x18a   :  { %v510_v34 = vpop.xlane.xlu0 %509 }
 0x18b   :  { %v511_v35 = vsub.f32 %v506_v32, %v510_v34 }
 0x18d   :  { %v512_v36 = vmul.f32 1.442695, %v511_v35 }
 0x18f   :  { %1075 = vpow2.f32 %v512_v36 }
 0x19c   :  { %v1076_v37 = vpop.eup %1075 }
 0x19d   :  { %v514_v38 = vsel %vm507_vm2, %v1076_v37, 0.0 }
 0x19e   :  { %515 = vadd.xlane.f32.xlu0 %v514_v38 }
 0x227   :  { %v516_v45 = vpop.xlane.xlu0 %515 }
 0x228   :  { %1077 = vrcp.f32 %v516_v45 }
 0x235   :  { %v1078_v46 = vpop.eup %1077 }
 0x236   :  { %v518_v47 = vmul.f32 %v1078_v46, %v1076_v37 }
 0x238   :  { %v520_v48 = vsel %vm507_vm2, %v518_v47, 0 }
 0x239   :  { %v588_v49 = vand.u32 4294901760, %v520_v48 }
 0x23b   :  { %v589_v50 = vsub.f32 %v520_v48, %v588_v49  ;;  %1047 = vmatmul.mubr.f32.vlgmr.msra.gmra.mxu1 %v588_v49 }
 0x23c   :  { %1055 = vmatpush3.msra.mxu1 %v553_v40  ;;  %1056 = vmatprep.mubr.msk.f32.mxu1 %vm1169_vm0, %v1168_v0 }
 0x23d   :  { %v590_v51 = vand.u32 4294901760, %v589_v50  ;;  %1064 = vmatprep.subr.mxu1 %v1168_v0 }
 0x23f   :  { %1057 = vmatmul.mubr.f32.vlgmr.msra.gmra.mxu1 %v590_v51  ;;  %v591_v52 = vsub.f32 %v589_v50, %v590_v51 }
 0x240   :  { %1065 = vmatpush3.msra.mxu1 %v553_v40  ;;  %1066 = vmatprep.mubr.msk.f32.mxu1 %vm1169_vm0, %v1168_v0 }
 0x241   :  { %v592_v53 = vand.u32 4294901760, %v591_v52 }
 0x243   :  { %1042 = vmatmul.mubr.f32.vlgmr.msra.gmra.mxu0 %v592_v53  ;;  %1067 = vmatmul.mubr.f32.vlgmr.msra.gmra.mxu1 %v588_v49 }
 0x244   :  { %1050 = vmatpush3.msra.mxu0 %v630_v41  ;;  %1051 = vmatprep.mubr.msk.f32.mxu0 %vm1169_vm0, %v1168_v0 }
 0x245   :  { %1059 = vmatprep.subr.mxu0 %v1168_v0 }
 0x247   :  { %1052 = vmatmul.mubr.f32.vlgmr.msra.gmra.mxu0 %v589_v50 }
 0x248   :  { %1060 = vmatpush3.msra.mxu0 %v631_v42  ;;  %1061 = vmatprep.mubr.msk.f32.mxu0 %vm1169_vm0, %v1168_v0 }
 0x24b   :  { %1062 = vmatmul.mubr.f32.vlgmr.msra.gmra.mxu0 %v588_v49 }
 0x2fb   :  { %v670_v54 = vpop.f32.mrf.mxu1 }
 0x2fd   :  { %v1048_v55 = vpop.f32.mrf.mxu1 }
 0x2ff   :  { %v818_v56 = vpop.f32.mrf.mxu1 }
 0x301   :  { %v1058_v57 = vpop.f32.mrf.mxu1 }
 0x303   :  { %v594_v58 = vpop.f32.mrf.mxu0  ;;  %v964_v59 = vpop.f32.mrf.mxu1 }
 0x304   :  { %v671_v62 = vadd.f32 %v670_v54, %v594_v58 }
 0x305   :  { %v1043_v60 = vpop.f32.mrf.mxu0  ;;  %v1068_v61 = vpop.f32.mrf.mxu1 }
 0x307   :  { %v744_v63 = vpop.f32.mrf.mxu0 }
 0x308   :  { %v745_v1 = vadd.f32 %v744_v63, %v671_v62 }
 0x309   :  { %v1053_v2 = vpop.f32.mrf.mxu0 }
 0x30a   :  { %v819_v3 = vadd.f32 %v818_v56, %v745_v1 }
 0x30b   :  { %v892_v4 = vpop.f32.mrf.mxu0 }
 0x30c   :  { %v893_v5 = vadd.f32 %v892_v4, %v819_v3 }
 0x30d   :  { %v1063_v6 = vpop.f32.mrf.mxu0 }
 0x30e   :  { %v965_v0 = vadd.f32 %v964_v59, %v893_v5 }
 0x310   :  { %968 = vst.msk [vmem:[#allocation8] sm:$0xff] %vm53_vm1, %v965_v0 }
 0x311   :  { %1150 = shalt.err (!%p1147_p5)
}
 0x312   :  { %978 = dma.vmem_to_hbm [thread:$0]  %s976_s2, 128, %s1248_s3, [#allocation4]  }
 0x313   :  { %1163 = dma.done.wait [#allocation4], 128  }
 0x314   :  { %1164 = vsyncadd [#allocation4], 4294967168 }
 0x315   :  { %982 = vsyncpa [#allocation3], 1 }
 0x316   :  { %983 = vsyncpa [#allocation6], 1 }
 0x317   :  { %984 = vsyncpa [#allocation4], 1 }

</bundles_post_ra>
